<compile_context>
chip_gen: v5e
topology: v5e:2x2
jax: 0.10.0
libtpu: 0.0.40
codegen_flags: <defaults>
</compile_context>

<pallas_src>
import jax
import jax.numpy as jnp
from jax.experimental import pallas as pl
from jax.experimental.pallas import tpu as pltpu


def _choice_head_kernel(x_ref, w_ref, b_ref, idx_ref, o_ref):
    """One batch tile of the fused "run-all-choices then gather" head.

    x_ref:   [TB, H]      bf16  activations (MXU operand)
    w_ref:   [H,  C*Ap]   bf16  all C per-choice weight slabs, fused on lanes
    b_ref:   [1,  C*Ap]   f32   fused biases
    idx_ref: [TB, 1]      int32 0-based choice per row
    o_ref:   [TB, Ap]     f32   selected head output (lane-padded)
    """
    TB, Ap = o_ref.shape
    C = w_ref.shape[-1] // Ap

    # One MXU pass over all C choices, f32 accumulation.
    y = jnp.dot(x_ref[...], w_ref[...], preferred_element_type=jnp.float32)
    y = y + b_ref[...]                                    # [TB, C*Ap]

    idx = idx_ref[...]                                    # [TB, 1] int32

    # torch.gather along the choice axis: C static, lane-aligned width-Ap
    # slices and boolean selects (no mask-multiply -> no 0*inf/NaN poisoning,
    # no VALU adds).  Out-of-range idx -> all-zero row (documented).
    sel = jnp.zeros((TB, Ap), jnp.float32)
    for c in range(C):
        sel = jnp.where(idx == c, y[:, c * Ap:(c + 1) * Ap], sel)

    o_ref[...] = sel.astype(o_ref.dtype)


def fuse_choice_head_params(w, b, *, compute_dtype=jnp.bfloat16):
    """Pre-fuse ChoiceHead linear params ONCE at init time.

    w: [C, H, A] per-choice weights, b: [C, A] per-choice biases.
    Each choice's output dim is lane-padded to a multiple of 128 so in-kernel
    slices and the output store stay lane-dense.  The transpose / relayout and
    the bf16 cast happen here, never in the per-step call path.
    """
    C, H, A = w.shape
    Ap = ((A + 127) // 128) * 128
    w = jnp.pad(w, ((0, 0), (0, 0), (0, Ap - A)))
    b = jnp.pad(b, ((0, 0), (0, Ap - A)))
    w_flat = jnp.transpose(w, (1, 0, 2)).reshape(H, C * Ap).astype(compute_dtype)
    b_flat = b.reshape(1, C * Ap).astype(jnp.float32)
    return dict(w_flat=w_flat, b_flat=b_flat, num_choices=C,
                out_dim=A, out_dim_padded=Ap, compute_dtype=compute_dtype)


def _pick_batch_tile(batch):
    # MXU row height: 256 on v6e/v7x (256 also tiles cleanly into 128 on v5e),
    # 128 on v5e.  Tiny batches fall back to a single full-array block.
    for tb in (256, 128):
        if batch >= tb:
            return tb
    return batch


def choice_head_apply(params, x, idx_one_based):
    """ChoiceHead.forward with linear sub-models; returns the gathered [B, A]."""
    w_flat, b_flat = params["w_flat"], params["b_flat"]
    C, A, Ap = params["num_choices"], params["out_dim"], params["out_dim_padded"]
    B, H = x.shape

    TB = _pick_batch_tile(B)
    Bp = ((B + TB - 1) // TB) * TB

    # 1-based command -> 0-based gather index (torch: idx.type(int64) - 1).
    idx0 = (idx_one_based.astype(jnp.int32) - 1).reshape(B, 1)

    x_c = x.astype(params["compute_dtype"])
    if Bp != B:
        x_c = jnp.pad(x_c, ((0, Bp - B), (0, 0)))
        idx0 = jnp.pad(idx0, ((0, Bp - B), (0, 0)))   # padded rows sliced off below

    out = pl.pallas_call(
        _choice_head_kernel,
        out_shape=jax.ShapeDtypeStruct((Bp, Ap), jnp.float32),
        grid=(Bp // TB,),
        in_specs=[
            pl.BlockSpec((TB, H), lambda i: (i, 0)),            # x: batch-tiled
            pl.BlockSpec((H, C * Ap), lambda i: (0, 0),         # W: grid-invariant,
                         pipeline_mode=pl.Buffered(1)),          #    single-buffered
            pl.BlockSpec((1, C * Ap), lambda i: (0, 0),          # b: grid-invariant
                         pipeline_mode=pl.Buffered(1)),
            pl.BlockSpec((TB, 1), lambda i: (i, 0)),             # idx: batch-tiled
        ],
        out_specs=pl.BlockSpec((TB, Ap), lambda i: (i, 0)),      # lane-dense f32
        compiler_params=pltpu.CompilerParams(
            dimension_semantics=("parallel",),   # shard batch tiles across TCs (v7x)
            vmem_limit_bytes=32 * 1024 * 1024,
        ),
    )(x_c, w_flat, b_flat, idx0)

    return out[:B, :A]


if __name__ == "__main__":
    key = jax.random.PRNGKey(0)
    kx, kw, kb, ki, kw2, kb2 = jax.random.split(key, 6)

    # Small shapes consistent with the module: batch=8, hidden=32, command_n=4.
    # Actor-like head: output 128 (already lane-aligned).
    # Critic-like head (RegressionHead "pred"): output 1 (lane-padded wrapper-side).
    B, H, C = 8, 32, 4
    A_actor, A_critic = 128, 1

    x = jax.random.normal(kx, (B, H), dtype=jnp.float32)
    idx = jax.random.randint(ki, (B,), minval=1, maxval=C + 1, dtype=jnp.int32)

    w_a = jax.random.normal(kw, (C, H, A_actor), dtype=jnp.float32) * 0.05
    b_a = jax.random.normal(kb, (C, A_actor), dtype=jnp.float32) * 0.01
    w_c = jax.random.normal(kw2, (C, H, A_critic), dtype=jnp.float32) * 0.05
    b_c = jax.random.normal(kb2, (C, A_critic), dtype=jnp.float32) * 0.01

    # Fuse once (init time), reuse every forward.
    actor_params = fuse_choice_head_params(w_a, b_a)
    critic_params = fuse_choice_head_params(w_c, b_c)

    logit = choice_head_apply(actor_params, x, idx)    # actor head "logit"/"mu"
    value = choice_head_apply(critic_params, x, idx)   # critic head "pred"
    jax.block_until_ready((logit, value))

    # Pure-JAX f32 reference (ChoiceHead.forward + torch.gather semantics).
    def ref_choice_head(w, b, x, idx):
        stacked = jnp.einsum("bh,cha->bac", x, w) + jnp.transpose(b)[None, :, :]
        i0 = (idx.astype(jnp.int32) - 1)[:, None, None]
        i0 = jnp.broadcast_to(i0, (x.shape[0], w.shape[-1], 1))
        return jnp.take_along_axis(stacked, i0, axis=-1).squeeze(-1)

    ref_logit = ref_choice_head(w_a, b_a, x, idx)
    ref_value = ref_choice_head(w_c, b_c, x, idx)

    assert logit.shape == (B, A_actor)
    assert value.shape == (B, A_critic)
    # bf16 MXU operands vs. f32 reference -> ~1e-2-level error; tolerance loosened.
    assert jnp.allclose(logit, ref_logit, atol=2e-2, rtol=2e-2), \
        float(jnp.max(jnp.abs(logit - ref_logit)))
    assert jnp.allclose(value, ref_value, atol=2e-2, rtol=2e-2), \
        float(jnp.max(jnp.abs(value - ref_value)))
    print("KERNEL_OK")
</pallas_src>

<mosaic_0001>
module attributes {stable_mosaic.version = 11 : i64} {
  func.func @_choice_head_kernel(%arg0: i32, %arg1: memref<8x32xbf16, #tpu.memory_space<vmem>>, %arg2: memref<32x512xbf16, #tpu.memory_space<vmem>>, %arg3: memref<1x512xf32, #tpu.memory_space<vmem>>, %arg4: memref<8x1xi32, #tpu.memory_space<vmem>>, %arg5: memref<8x128xf32, #tpu.memory_space<vmem>>) attributes {dimension_semantics = [#tpu.dimension_semantics<parallel>], iteration_bounds = array<i64: 1>, scalar_prefetch = 0 : i64, scratch_operands = 0 : i64, tpu.core_type = #tpu.core_type<tc>, window_params = [{transform_indices = @transform_0, window_bounds = array<i64: 8, 32>}, {pipeline_mode = #tpu.pipeline_mode<synchronous>, transform_indices = @transform_1, window_bounds = array<i64: 32, 512>}, {pipeline_mode = #tpu.pipeline_mode<synchronous>, transform_indices = @transform_2, window_bounds = array<i64: 1, 512>}, {transform_indices = @transform_3, window_bounds = array<i64: 8, 1>}, {transform_indices = @transform_4, window_bounds = array<i64: 8, 128>}]} {
    %c0 = arith.constant 0 : index
    %c0_0 = arith.constant 0 : index
    %0 = vector.load %arg1[%c0, %c0_0] : memref<8x32xbf16, #tpu.memory_space<vmem>>, vector<8x32xbf16>
    %c0_1 = arith.constant 0 : index
    %c0_2 = arith.constant 0 : index
    %1 = vector.load %arg2[%c0_1, %c0_2] : memref<32x512xbf16, #tpu.memory_space<vmem>>, vector<32x512xbf16>
    %cst = arith.constant dense<0.000000e+00> : vector<8x512xf32>
    %2 = tpu.matmul %0, %1, %cst {dimension_numbers = #tpu.dot_dimension_numbers<[1], [0], [0], [1], [0, 0, 1, 1], [], []>} : vector<8x32xbf16>, vector<32x512xbf16>, vector<8x512xf32> -> vector<8x512xf32>
    %c0_3 = arith.constant 0 : index
    %c0_4 = arith.constant 0 : index
    %3 = vector.load %arg3[%c0_3, %c0_4] : memref<1x512xf32, #tpu.memory_space<vmem>>, vector<1x512xf32>
    %4 = vector.broadcast %3 : vector<1x512xf32> to vector<8x512xf32>
    %5 = arith.addf %2, %4 : vector<8x512xf32>
    %c0_5 = arith.constant 0 : index
    %c0_6 = arith.constant 0 : index
    %6 = vector.load %arg4[%c0_5, %c0_6] : memref<8x1xi32, #tpu.memory_space<vmem>>, vector<8x1xi32>
    %cst_7 = arith.constant 0.000000e+00 : f32
    %7 = vector.broadcast %cst_7 : f32 to vector<8x128xf32>
    %c0_i32 = arith.constant 0 : i32
    %8 = vector.broadcast %c0_i32 : i32 to vector<8x1xi32>
    %9 = arith.cmpi eq, %6, %8 : vector<8x1xi32>
    %10 = vector.extract_strided_slice %5 {offsets = [0, 0], sizes = [8, 128], strides = [1, 1]} : vector<8x512xf32> to vector<8x128xf32>
    %11 = vector.shape_cast %9 : vector<8x1xi1> to vector<8x1xi1>
    %12 = vector.broadcast %11 : vector<8x1xi1> to vector<8x128xi1>
    %13 = arith.select %12, %10, %7 : vector<8x128xi1>, vector<8x128xf32>
    %c1_i32 = arith.constant 1 : i32
    %14 = vector.broadcast %c1_i32 : i32 to vector<8x1xi32>
    %15 = arith.cmpi eq, %6, %14 : vector<8x1xi32>
    %16 = vector.extract_strided_slice %5 {offsets = [0, 128], sizes = [8, 128], strides = [1, 1]} : vector<8x512xf32> to vector<8x128xf32>
    %17 = vector.shape_cast %15 : vector<8x1xi1> to vector<8x1xi1>
    %18 = vector.broadcast %17 : vector<8x1xi1> to vector<8x128xi1>
    %19 = arith.select %18, %16, %13 : vector<8x128xi1>, vector<8x128xf32>
    %c2_i32 = arith.constant 2 : i32
    %20 = vector.broadcast %c2_i32 : i32 to vector<8x1xi32>
    %21 = arith.cmpi eq, %6, %20 : vector<8x1xi32>
    %22 = vector.extract_strided_slice %5 {offsets = [0, 256], sizes = [8, 128], strides = [1, 1]} : vector<8x512xf32> to vector<8x128xf32>
    %23 = vector.shape_cast %21 : vector<8x1xi1> to vector<8x1xi1>
    %24 = vector.broadcast %23 : vector<8x1xi1> to vector<8x128xi1>
    %25 = arith.select %24, %22, %19 : vector<8x128xi1>, vector<8x128xf32>
    %c3_i32 = arith.constant 3 : i32
    %26 = vector.broadcast %c3_i32 : i32 to vector<8x1xi32>
    %27 = arith.cmpi eq, %6, %26 : vector<8x1xi32>
    %28 = vector.extract_strided_slice %5 {offsets = [0, 384], sizes = [8, 128], strides = [1, 1]} : vector<8x512xf32> to vector<8x128xf32>
    %29 = vector.shape_cast %27 : vector<8x1xi1> to vector<8x1xi1>
    %30 = vector.broadcast %29 : vector<8x1xi1> to vector<8x128xi1>
    %31 = arith.select %30, %28, %25 : vector<8x128xi1>, vector<8x128xf32>
    %c0_8 = arith.constant 0 : index
    %c0_9 = arith.constant 0 : index
    %32 = vector.load %arg5[%c0_8, %c0_9] : memref<8x128xf32, #tpu.memory_space<vmem>>, vector<8x128xf32>
    tpu.vector_store %arg5[%c0_8, %c0_9], %31 {strides = array<i32>} : memref<8x128xf32, #tpu.memory_space<vmem>>, vector<8x128xf32>,
    return
  }
  func.func @transform_0(%arg0: i32) -> (i32, i32) {
    %c0_i32 = arith.constant 0 : i32
    %c0_i32_0 = arith.constant 0 : i32
    return %arg0, %c0_i32 : i32, i32
  }
  func.func @transform_1(%arg0: i32) -> (i32, i32) {
    %c0_i32 = arith.constant 0 : i32
    %c0_i32_0 = arith.constant 0 : i32
    %c0_i32_1 = arith.constant 0 : i32
    return %c0_i32, %c0_i32_0 : i32, i32
  }
  func.func @transform_2(%arg0: i32) -> (i32, i32) {
    %c0_i32 = arith.constant 0 : i32
    %c0_i32_0 = arith.constant 0 : i32
    %c0_i32_1 = arith.constant 0 : i32
    return %c0_i32, %c0_i32_0 : i32, i32
  }
  func.func @transform_3(%arg0: i32) -> (i32, i32) {
    %c0_i32 = arith.constant 0 : i32
    %c0_i32_0 = arith.constant 0 : i32
    return %arg0, %c0_i32 : i32, i32
  }
  func.func @transform_4(%arg0: i32) -> (i32, i32) {
    %c0_i32 = arith.constant 0 : i32
    %c0_i32_0 = arith.constant 0 : i32
    return %arg0, %c0_i32 : i32, i32
  }
}

</mosaic_0001>

<bundles_post_ra>
// kernel: tpu_custom_call.1
= control target key start
LH: loop header
LB: loop body
LE: loop exit
PB: predicated region body
PF: predicated region fallthrough
CT: control target
= control target key end

     0   :  { %9 = vsyncpa [#allocation3], 0  ;;  %s345_s0 = inlined_call_operand.vmem [shape: bf16[8,32], index: 0, kind: input, shape index: {}]   ;;  %s346_s1 = inlined_call_operand.hbm [shape: bf16[32,512], index: 1, kind: input, shape index: {}]   ;;  %s347_s2 = inlined_call_operand.vmem [shape: f32[1,512], index: 2, kind: input, shape index: {}]   ;;  %s348_s3 = inlined_call_operand.vmem [shape: s32[8,1], index: 3, kind: input, shape index: {}]   ;;  %s349_s4 = inlined_call_operand.hbm [shape: f32[8,128], index: 4, kind: output, shape index: {}]  }
   0x1   :  { %10 = vsyncpa [#allocation4], 0  ;;  %s17_s17 = sshll.u32 %s346_s1, 4  ;;  %s300_s18 = smov [#allocation2]   ;;  %s18_s17 = int_to_ptr.hbm [resolvable:$true] %s17_s17 }
   0x2   :  { %s19_s19 = sshll.u32 %s300_s18, 4  ;;  %s301_s20 = smov 256   ;;  %s20_s19 = int_to_ptr.vmem [resolvable:$true] %s19_s19 }
   0x3   :  { %s302_s21 = smov 16  }
   0x4   :  { %25 = dma.hbm_to_vmem [thread:$0]  %s18_s17, 1024, %s20_s19, [#allocation3], %s301_s20, %s301_s20, %s302_s21  }
   0x5   :  { %296 = dma.done.wait [#allocation3], 1024  }
   0x6   :  { %297 = vsyncadd [#allocation3], 4294966272  ;;  %v303_v0 = vmov 0   ;;  %v215_v1 = vld [vmem:[#allocation2 + $0x20] sm:$0xf]  ;;  %vm94_vm2 = vcmask 261120  }
   0x7   :  { %246 = vset.pattern.permute.xlu0 %v303_v0  ;;  %247 = vset.pattern.permute.xlu1 %v303_v0  ;;  %v239_v2 = vld [vmem:[#allocation2 + $0x2c] sm:$0xf0]  ;;  %v237_v3 = vld [vmem:[#allocation2 + $0x24] sm:$0xf]  ;;  %v217_v5 = vld [vmem:[#allocation2 + $0x30] sm:$0xf0] }
   0x8   :  { %v216_v4 = vor.u32 %v239_v2, %v215_v1  ;;  %v223_v6 = vld [vmem:[#allocation2 + $0x28] sm:$0xf]  ;;  %v240_v7 = vld [vmem:[#allocation2 + $0x34] sm:$0xf0]  ;;  %v220_v8 = vor.u32 %v237_v3, %v217_v5  ;;  %v238_v10 = vld [vmem:[#allocation2 + $0x2c] sm:$0xf] }
   0x9   :  { %v224_v9 = vor.u32 %v240_v7, %v223_v6  ;;  %v225_v11 = vld [vmem:[#allocation2 + $0x38] sm:$0xf0]  ;;  %v199_v12 = vld [vmem:[#allocation2] sm:$0xf]  ;;  %v235_v14 = vld [vmem:[#allocation2 + $0xc] sm:$0xf0] }
   0xa   :  { %104 = vmatpush.bf16.msra.mxu0 %v216_v4  ;;  %v228_v13 = vor.u32 %v238_v10, %v225_v11  ;;  %v233_v15 = vld [vmem:[#allocation2 + $0x4] sm:$0xf]  ;;  %v201_v16 = vld [vmem:[#allocation2 + $0x10] sm:$0xf0]  ;;  %117 = vmatpush.bf16.msra.mxu1 %v220_v8  ;;  %v200_v17 = vor.u32 %v235_v14, %v199_v12  ;;  %v207_v19 = vld [vmem:[#allocation2 + $0x8] sm:$0xf] }
   0xb   :  { %130 = vmatpush.bf16.msra.mxu2 %v224_v9  ;;  %v204_v18 = vor.u32 %v233_v15, %v201_v16  ;;  %v236_v20 = vld [vmem:[#allocation2 + $0x14] sm:$0xf0]  ;;  %v234_v21 = vld [vmem:[#allocation2 + $0xc] sm:$0xf]  ;;  %v209_v23 = vld [vmem:[#allocation2 + $0x18] sm:$0xf0] }
   0xc   :  { %143 = vmatpush.bf16.msra.mxu3 %v228_v13  ;;  %v208_v22 = vor.u32 %v236_v20, %v207_v19  ;;  %v150_v24 = vld [vmem:[%s348_s3] sm:$0xff]  ;;  %v212_v25 = vor.u32 %v234_v21, %v209_v23  ;;  %s304_s25 = smov [#allocation5]  }
   0xd   :  { %vm151_vm0 = vcmp.eq.s32.totalorder %v150_v24, 0  ;;  %vm165_vm1 = vcmp.eq.s32.totalorder %v150_v24, 2  ;;  %v35_v26 = vld [vmem:[%s345_s0] sm:$0xf]  ;;  %vm158_vm3 = vcmp.eq.s32.totalorder %v150_v24, 1  ;;  %vm172_vm4 = vcmp.eq.s32.totalorder %v150_v24, 3 }
   0xe   :  { %105 = vmatpush.bf16.msra.mxu0 %v200_v17  ;;  %v152_v27 = vsel %vm151_vm0, 1, %v303_v0  ;;  %v166_v28 = vsel %vm165_vm1, 1, %v303_v0  ;;  %118 = vmatpush.bf16.msra.mxu1 %v204_v18  ;;  %v159_v29 = vsel %vm158_vm3, 1, %v303_v0  ;;  %v173_v30 = vsel %vm172_vm4, 1, %v303_v0  ;;  %v44_v32 = vld [vmem:[%s347_s2] sm:$0xf] }
   0xf   :  { %131 = vmatpush.bf16.msra.mxu2 %v208_v22  ;;  %154 = vperm.xlu0 %246, %v152_v27   ;;  %v46_v34 = vperm.slane %v44_v32, 0  ;;  %v47_v36 = vperm.slane %v44_v32, 1  ;;  %v48_v39 = vperm.slane %v44_v32, 2  ;;  %v49_v42 = vperm.slane %v44_v32, 3  ;;  %s185_s26 = sshll.u32 %s304_s25, 4  ;;  %s187_s2 = sshll.u32 %s349_s4, 4  ;;  %s186_s26 = int_to_ptr.vmem [resolvable:$true] %s185_s26  ;;  %s188_s2 = int_to_ptr.hbm [resolvable:$true] %s187_s2 }
  0x10   :  { %144 = vmatpush.bf16.msra.mxu3 %v212_v25  ;;  %168 = vperm.xlu1 %247, %v166_v28  }
  0x11   :  { %229 = vmatmul.msk.bf16.vlgmr.msra.gmra.mxu0 %vm94_vm2, %v35_v26  ;;  %230 = vmatmul.msk.bf16.vlgmr.msra.gmra.mxu1 %vm94_vm2, %v35_v26 }
  0x12   :  { %231 = vmatmul.msk.bf16.vlgmr.msra.gmra.mxu2 %vm94_vm2, %v35_v26 }
  0x13   :  { %232 = vmatmul.msk.bf16.vlgmr.msra.gmra.mxu3 %vm94_vm2, %v35_v26 }
  0x17   :  { %161 = vperm.xlu0 %246, %v159_v29  }
  0x18   :  { %175 = vperm.xlu1 %247, %v173_v30  }
  0x81   :  { %v155_v31 = vpop.permute.xlu0 %154 }
  0x82   :  { %v169_v33 = vpop.permute.xlu1 %168  ;;  %vm156_vm5 = vcmp.eq.s32.totalorder %v155_v31, 1 }
  0x83   :  { %vm170_vm7 = vcmp.eq.s32.totalorder %v169_v33, 1 }
  0x89   :  { %v162_v40 = vpop.permute.xlu0 %161 }
  0x8a   :  { %v176_v44 = vpop.permute.xlu1 %175  ;;  %vm163_vm6 = vcmp.eq.s32.totalorder %v162_v40, 1 }
  0x8b   :  { %vm177_vm8 = vcmp.eq.s32.totalorder %v176_v44, 1 }
  0x8e   :  { %v107_v35 = vpop.f32.mrf.mxu0  ;;  %v120_v37 = vpop.f32.mrf.mxu1 }
  0x8f   :  { %v108_v38 = vadd.f32 %v107_v35, %v46_v34  ;;  %v121_v41 = vadd.f32 %v120_v37, %v47_v36 }
  0x91   :  { %v157_v43 = vsel %vm156_vm5, %v108_v38, 0.0 }
  0x92   :  { %v164_v49 = vsel %vm163_vm6, %v121_v41, %v157_v43 }
  0x95   :  { %v133_v45 = vpop.f32.mrf.mxu2 }
  0x96   :  { %v134_v46 = vadd.f32 %v133_v45, %v48_v39  ;;  %v146_v47 = vpop.f32.mrf.mxu3  ;;  %v109_v48 = vpop.f32.mrf.mxu0 }
  0x97   :  { %v147_v50 = vadd.f32 %v146_v47, %v49_v42  ;;  %v122_v51 = vpop.f32.mrf.mxu1 }
  0x98   :  { %v171_v52 = vsel %vm170_vm7, %v134_v46, %v164_v49 }
  0x99   :  { %v178_v53 = vsel %vm177_vm8, %v147_v50, %v171_v52 }
  0x9a   :  { %179 = vst [vmem:[#allocation5] sm:$0xff] %v178_v53 }
  0x9b   :  { %190 = dma.vmem_to_hbm [thread:$0]  %s186_s26, 128, %s188_s2, [#allocation4]  }
  0x9d   :  { %v135_v54 = vpop.f32.mrf.mxu2 }
  0x9e   :  { %v148_v55 = vpop.f32.mrf.mxu3 }
  0x9f   :  { %298 = dma.done.wait [#allocation4], 128  }
  0xa0   :  { %299 = vsyncadd [#allocation4], 4294967168 }
  0xa1   :  { %195 = vsyncpa [#allocation3], 1 }
  0xa2   :  { %196 = vsyncpa [#allocation4], 1 }

</bundles_post_ra>
